<compile_context>
chip_gen: v7x
topology: tpu7x:2x2x1
jax: 0.10.0
libtpu: 0.0.40
codegen_flags: <defaults>
</compile_context>

<pallas_src>
import math

import jax
import jax.numpy as jnp
from jax.experimental import pallas as pl
from jax.experimental.pallas import tpu as pltpu


def _round_up(x, m):
    return ((x + m - 1) // m) * m


def _sublane_multiple(dtype):
    # Sub-32-bit dtypes pack along sublanes: 16 rows for bf16, 32 for int8/fp8.
    return {4: 8, 2: 16, 1: 32}.get(jnp.dtype(dtype).itemsize, 8)


def _choose_batch_tile(b, block_b, sub, min_tiles=2):
    """Largest tile <= block_b that is a multiple of `sub`, divides `b` (no
    pad/slice in the wrapper) and leaves >= min_tiles grid steps when the
    batch allows (keeps both v7x TensorCores busy)."""
    if b % sub != 0:
        return b  # full-extent single tile (valid block; avoids any padding)
    cap = min(block_b, b)
    if min_tiles > 1 and b >= min_tiles * sub:
        cap = min(cap, max(sub, (b // min_tiles) // sub * sub))
    t = max(sub, (cap // sub) * sub)
    while t > sub and b % t != 0:
        t -= sub
    return t


def _vmem_bytes_estimate(tb, in_size, h, mm_dtype, io_dtype):
    """Rough VMEM footprint (double-buffered operands + scratch)."""
    mm = jnp.dtype(mm_dtype).itemsize
    io = jnp.dtype(io_dtype).itemsize
    two_h = 2 * h
    est = 0
    est += 2 * tb * in_size * mm                      # x_t tile
    est += 2 * tb * h * (mm + io)                     # h0 + c0 tiles
    est += 2 * (in_size + h) * two_h * mm             # resident Wx, Wh
    est += 2 * two_h * 4                              # bias
    est += 2 * tb * h * io                            # cy output tile
    est += tb * h * (mm + 4)                          # carried h (mm) + c (f32)
    return est


def _janet_seq_kernel(x_ref, h0_ref, c0_ref, wx_ref, wh_ref, b_ref,
                      cy_ref, h_sc, c_sc):
    """One JANET timestep on a (tb, H) batch tile; state carried in VMEM scratch.

        gates = x @ WxT + h @ WhT + b
        f, c  = split(gates, 2, axis=1)
        cy    = sigmoid(f) * c_prev + (1 - sigmoid(f - 1)) * tanh(c)
        hy    = cy
    """
    t = pl.program_id(1)
    H = c0_ref.shape[-1]

    @pl.when(t == 0)
    def _():
        h_sc[...] = h0_ref[...]
        c_sc[...] = c0_ref[...].astype(jnp.float32)

    # Two MXU dots accumulated in f32 (no concatenated [x, h] operand needed).
    gates = (
        jnp.dot(x_ref[...], wx_ref[...], preferred_element_type=jnp.float32)
        + jnp.dot(h_sc[...], wh_ref[...], preferred_element_type=jnp.float32)
        + b_ref[...].astype(jnp.float32)
    )

    # H is kept a multiple of 128 by convention so these slices stay lane-aligned.
    forgetgate = gates[:, :H]
    cellgate = jnp.tanh(gates[:, H:])

    # Numerically-stable sigmoids (beta = 1): 3 EUP pushes total per element,
    # no exp overflow / approx-reciprocal drift across long sequences.
    sig_f = jax.nn.sigmoid(forgetgate)
    sig_f_shift = jax.nn.sigmoid(forgetgate - 1.0)

    cy = sig_f * c_sc[...] + (1.0 - sig_f_shift) * cellgate

    c_sc[...] = cy                            # f32 carry for accuracy
    h_sc[...] = cy.astype(h_sc.dtype)         # next-step MXU operand dtype
    cy_ref[...] = cy.astype(cy_ref.dtype)     # hy == cy; store once


def janet_sequence(xs, h0, c0, wx_t, wh_t, bias, *, block_b=256,
                   matmul_dtype=jnp.bfloat16):
    """Run T JANET steps in a single pallas_call.

    Returns (cys, (hT, cT)) where cys has shape (T, B, H) and hy_t == cy_t.
    """
    T, B, in_size = xs.shape
    H = h0.shape[-1]
    out_dtype = c0.dtype
    mm_dtype = matmul_dtype if matmul_dtype is not None else xs.dtype

    xs_mm = xs.astype(mm_dtype)
    h0_mm = h0.astype(mm_dtype)
    wx_mm = wx_t.astype(mm_dtype)
    wh_mm = wh_t.astype(mm_dtype)
    bias2d = bias.reshape(1, -1).astype(jnp.float32)

    sub = _sublane_multiple(mm_dtype)
    # Pad only in the rare large-and-unaligned case; otherwise use a tile that
    # divides B (or the full batch as one block) so no pad/slice HBM copies.
    b_pad = _round_up(B, sub) if (B % sub != 0 and B > block_b) else B
    c0_io = c0
    if b_pad != B:
        xs_mm = jnp.pad(xs_mm, ((0, 0), (0, b_pad - B), (0, 0)))
        h0_mm = jnp.pad(h0_mm, ((0, b_pad - B), (0, 0)))
        c0_io = jnp.pad(c0, ((0, b_pad - B), (0, 0)))
    tb = _choose_batch_tile(b_pad, block_b, sub, min_tiles=2)
    nb = b_pad // tb

    est = _vmem_bytes_estimate(tb, in_size, H, mm_dtype, out_dtype)
    # Cap under v7x's 64 MiB physical VMEM; raise above the 16/32 MiB scoped
    # defaults when the footprint needs it.  (For very large H, additionally
    # tile the 2H axis and/or single-buffer the resident weights.)
    vmem_limit = int(min(max(2 * est, 32 * 1024 * 1024), 60 * 1024 * 1024))

    io_sz = jnp.dtype(out_dtype).itemsize
    mm_sz = jnp.dtype(mm_dtype).itemsize
    cost = pl.CostEstimate(
        flops=2 * T * b_pad * (in_size + H) * 2 * H,
        transcendentals=3 * T * b_pad * H,            # tanh + 2 sigmoids
        bytes_accessed=int(
            xs_mm.size * mm_sz + h0_mm.size * mm_sz + c0_io.size * io_sz
            + (wx_mm.size + wh_mm.size) * mm_sz + bias2d.size * 4
            + T * b_pad * H * io_sz),
    )

    cys = pl.pallas_call(
        _janet_seq_kernel,
        out_shape=jax.ShapeDtypeStruct((T, b_pad, H), out_dtype),
        grid=(nb, T),
        in_specs=[
            pl.BlockSpec((None, tb, in_size), lambda b, t: (t, b, 0)),  # x_t
            pl.BlockSpec((tb, H), lambda b, t: (b, 0)),                 # h0
            pl.BlockSpec((tb, H), lambda b, t: (b, 0)),                 # c0
            pl.BlockSpec((in_size, 2 * H), lambda b, t: (0, 0)),        # WxT resident
            pl.BlockSpec((H, 2 * H), lambda b, t: (0, 0)),              # WhT resident
            pl.BlockSpec((1, 2 * H), lambda b, t: (0, 0)),              # bias resident
        ],
        out_specs=pl.BlockSpec((None, tb, H), lambda b, t: (t, b, 0)),
        scratch_shapes=[
            pltpu.VMEM((tb, H), mm_dtype),     # carried hidden state (MXU dtype)
            pltpu.VMEM((tb, H), jnp.float32),  # carried cell state (f32)
        ],
        compiler_params=pltpu.CompilerParams(
            dimension_semantics=("parallel", "arbitrary"),
            vmem_limit_bytes=vmem_limit,
        ),
        cost_estimate=cost,
    )(xs_mm, h0_mm, c0_io, wx_mm, wh_mm, bias2d)

    if b_pad != B:
        cys = cys[:, :B, :]
    last = cys[-1]
    return cys, (last, last)


def janet_cell(x, hx, cx, wx_t, wh_t, bias, *, block_b=256,
               matmul_dtype=jnp.bfloat16):
    """Single JANET cell step == JANETCell.forward.  Returns (hy, cy), hy is cy."""
    _, (hy, cy) = janet_sequence(x[None], hx, cx, wx_t, wh_t, bias,
                                 block_b=block_b, matmul_dtype=matmul_dtype)
    return hy, cy


def janet_cell_ref(x, hx, cx, wx_t, wh_t, bias):
    """Pure-JAX reference mirroring the PyTorch forward."""
    H = hx.shape[-1]
    gates = x @ wx_t + hx @ wh_t + bias.reshape(1, -1)
    f, c = gates[:, :H], gates[:, H:]
    c = jnp.tanh(c)
    cy = jax.nn.sigmoid(f) * cx + (1.0 - jax.nn.sigmoid(f - 1.0)) * c
    return cy, cy


if __name__ == "__main__":
    # Small, lane-friendly shapes consistent with the module.
    batch, input_size, hidden_size, seq_len = 8, 128, 128, 6

    key = jax.random.PRNGKey(0)
    k_wx, k_wh, k_bx, k_bh, k_x, k_h, k_c, k_xs = jax.random.split(key, 8)

    # reset_parameters: U(-std, std); nn.Linear weights are (out, in) -> pre-transpose.
    std = 1.0 / math.sqrt(hidden_size)
    wx = jax.random.uniform(k_wx, (2 * hidden_size, input_size),
                            minval=-std, maxval=std, dtype=jnp.float32)
    wh = jax.random.uniform(k_wh, (2 * hidden_size, hidden_size),
                            minval=-std, maxval=std, dtype=jnp.float32)
    bx = jax.random.uniform(k_bx, (2 * hidden_size,),
                            minval=-std, maxval=std, dtype=jnp.float32)
    bh = jax.random.uniform(k_bh, (2 * hidden_size,),
                            minval=-std, maxval=std, dtype=jnp.float32)
    wx_t, wh_t, bias = wx.T, wh.T, bx + bh

    x = jax.random.normal(k_x, (batch, input_size), dtype=jnp.float32)
    hx = jax.random.normal(k_h, (batch, hidden_size), dtype=jnp.float32)
    cx = jax.random.normal(k_c, (batch, hidden_size), dtype=jnp.float32)
    xs = jax.random.normal(k_xs, (seq_len, batch, input_size), dtype=jnp.float32)

    # --- Single step (module forward), exact f32 MXU path: tight check. ---
    hy32, cy32 = janet_cell(x, hx, cx, wx_t, wh_t, bias, matmul_dtype=jnp.float32)
    jax.block_until_ready((hy32, cy32))
    hy_ref, cy_ref = janet_cell_ref(x, hx, cx, wx_t, wh_t, bias)
    assert jnp.allclose(cy32, cy_ref, atol=1e-5, rtol=1e-5)
    assert jnp.allclose(hy32, hy_ref, atol=1e-5, rtol=1e-5)

    # --- Single step, default bf16 MXU operands: mixed-precision tolerance. ---
    hy_bf, cy_bf = janet_cell(x, hx, cx, wx_t, wh_t, bias)
    jax.block_until_ready((hy_bf, cy_bf))
    assert jnp.allclose(cy_bf, cy_ref, atol=5e-2, rtol=5e-2)

    # --- Full recurrence in one pallas_call (time as 'arbitrary' grid axis). ---
    h, c = hx, cx
    refs = []
    for t in range(seq_len):
        h, c = janet_cell_ref(xs[t], h, c, wx_t, wh_t, bias)
        refs.append(c)
    cys_ref = jnp.stack(refs)

    cys_f32, (hT32, cT32) = janet_sequence(xs, hx, cx, wx_t, wh_t, bias,
                                           matmul_dtype=jnp.float32)
    jax.block_until_ready(cys_f32)
    assert jnp.allclose(cys_f32, cys_ref, atol=1e-4, rtol=1e-4)
    assert jnp.allclose(cT32, cys_ref[-1], atol=1e-4, rtol=1e-4)

    cys_bf, (hT, cT) = janet_sequence(xs, hx, cx, wx_t, wh_t, bias)
    jax.block_until_ready(cys_bf)
    assert jnp.allclose(cys_bf, cys_ref, atol=1e-1, rtol=5e-2)

    print("KERNEL_OK")
</pallas_src>

<mosaic_0001>
module attributes {stable_mosaic.version = 11 : i64} {
  func.func @_janet_seq_kernel(%arg0: i32, %arg1: i32, %arg2: memref<1x8x128xf32, #tpu.memory_space<vmem>>, %arg3: memref<8x128xf32, #tpu.memory_space<vmem>>, %arg4: memref<8x128xf32, #tpu.memory_space<vmem>>, %arg5: memref<128x256xf32, #tpu.memory_space<vmem>>, %arg6: memref<128x256xf32, #tpu.memory_space<vmem>>, %arg7: memref<1x256xf32, #tpu.memory_space<vmem>>, %arg8: memref<1x8x128xf32, #tpu.memory_space<vmem>>, %arg9: memref<8x128xf32, #tpu.memory_space<vmem>>, %arg10: memref<8x128xf32, #tpu.memory_space<vmem>>) attributes {dimension_semantics = [#tpu.dimension_semantics<parallel>, #tpu.dimension_semantics<arbitrary>], iteration_bounds = array<i64: 1, 1>, scalar_prefetch = 0 : i64, scratch_operands = 2 : i64, tpu.core_type = #tpu.core_type<tc>, window_params = [{transform_indices = @transform_0, window_bounds = array<i64: 1, 8, 128>}, {transform_indices = @transform_1, window_bounds = array<i64: 8, 128>}, {transform_indices = @transform_2, window_bounds = array<i64: 8, 128>}, {pipeline_mode = #tpu.pipeline_mode<synchronous>, transform_indices = @transform_3, window_bounds = array<i64: 128, 256>}, {pipeline_mode = #tpu.pipeline_mode<synchronous>, transform_indices = @transform_4, window_bounds = array<i64: 128, 256>}, {pipeline_mode = #tpu.pipeline_mode<synchronous>, transform_indices = @transform_5, window_bounds = array<i64: 1, 256>}, {transform_indices = @transform_6, window_bounds = array<i64: 1, 8, 128>}]} {
    %c0_i32 = arith.constant 0 : i32
    %0 = arith.cmpi eq, %arg1, %c0_i32 : i32
    %1 = arith.extui %0 : i1 to i32
    %c0_i32_0 = arith.constant 0 : i32
    %2 = arith.cmpi ne, %1, %c0_i32_0 : i32
    scf.if %2 {
      %c0_25 = arith.constant 0 : index
      %c0_26 = arith.constant 0 : index
      %40 = vector.load %arg3[%c0_25, %c0_26] : memref<8x128xf32, #tpu.memory_space<vmem>>, vector<8x128xf32>
      %c0_27 = arith.constant 0 : index
      %c0_28 = arith.constant 0 : index
      %41 = vector.load %arg9[%c0_27, %c0_28] : memref<8x128xf32, #tpu.memory_space<vmem>>, vector<8x128xf32>
      tpu.vector_store %arg9[%c0_27, %c0_28], %40 {strides = array<i32>} : memref<8x128xf32, #tpu.memory_space<vmem>>, vector<8x128xf32>,
      %c0_29 = arith.constant 0 : index
      %c0_30 = arith.constant 0 : index
      %42 = vector.load %arg4[%c0_29, %c0_30] : memref<8x128xf32, #tpu.memory_space<vmem>>, vector<8x128xf32>
      %c0_31 = arith.constant 0 : index
      %c0_32 = arith.constant 0 : index
      %43 = vector.load %arg10[%c0_31, %c0_32] : memref<8x128xf32, #tpu.memory_space<vmem>>, vector<8x128xf32>
      tpu.vector_store %arg10[%c0_31, %c0_32], %42 {strides = array<i32>} : memref<8x128xf32, #tpu.memory_space<vmem>>, vector<8x128xf32>,
    } else {
    }
    %c0 = arith.constant 0 : index
    %c0_1 = arith.constant 0 : index
    %c0_2 = arith.constant 0 : index
    %3 = vector.load %arg2[%c0, %c0_1, %c0_2] : memref<1x8x128xf32, #tpu.memory_space<vmem>>, vector<1x8x128xf32>
    %4 = vector.shape_cast %3 : vector<1x8x128xf32> to vector<8x128xf32>
    %c0_3 = arith.constant 0 : index
    %c0_4 = arith.constant 0 : index
    %5 = vector.load %arg5[%c0_3, %c0_4] : memref<128x256xf32, #tpu.memory_space<vmem>>, vector<128x256xf32>
    %cst = arith.constant dense<0.000000e+00> : vector<8x256xf32>
    %6 = tpu.matmul %4, %5, %cst {dimension_numbers = #tpu.dot_dimension_numbers<[1], [0], [0], [1], [0, 0, 1, 1], [], []>} : vector<8x128xf32>, vector<128x256xf32>, vector<8x256xf32> -> vector<8x256xf32>
    %c0_5 = arith.constant 0 : index
    %c0_6 = arith.constant 0 : index
    %7 = vector.load %arg9[%c0_5, %c0_6] : memref<8x128xf32, #tpu.memory_space<vmem>>, vector<8x128xf32>
    %c0_7 = arith.constant 0 : index
    %c0_8 = arith.constant 0 : index
    %8 = vector.load %arg6[%c0_7, %c0_8] : memref<128x256xf32, #tpu.memory_space<vmem>>, vector<128x256xf32>
    %cst_9 = arith.constant dense<0.000000e+00> : vector<8x256xf32>
    %9 = tpu.matmul %7, %8, %cst_9 {dimension_numbers = #tpu.dot_dimension_numbers<[1], [0], [0], [1], [0, 0, 1, 1], [], []>} : vector<8x128xf32>, vector<128x256xf32>, vector<8x256xf32> -> vector<8x256xf32>
    %10 = arith.addf %6, %9 : vector<8x256xf32>
    %c0_10 = arith.constant 0 : index
    %c0_11 = arith.constant 0 : index
    %11 = vector.load %arg7[%c0_10, %c0_11] : memref<1x256xf32, #tpu.memory_space<vmem>>, vector<1x256xf32>
    %12 = vector.broadcast %11 : vector<1x256xf32> to vector<8x256xf32>
    %13 = arith.addf %10, %12 : vector<8x256xf32>
    %14 = vector.extract_strided_slice %13 {offsets = [0, 0], sizes = [8, 128], strides = [1, 1]} : vector<8x256xf32> to vector<8x128xf32>
    %15 = vector.extract_strided_slice %13 {offsets = [0, 128], sizes = [8, 128], strides = [1, 1]} : vector<8x256xf32> to vector<8x128xf32>
    %16 = math.tanh %15 : vector<8x128xf32>
    %17 = arith.negf %14 : vector<8x128xf32>
    %18 = math.exp %17 : vector<8x128xf32>
    %cst_12 = arith.constant 1.000000e+00 : f32
    %19 = vector.broadcast %cst_12 : f32 to vector<8x128xf32>
    %20 = arith.addf %19, %18 : vector<8x128xf32>
    %21 = arith.divf %19, %20 : vector<8x128xf32>
    %cst_13 = arith.constant 1.000000e+00 : f32
    %22 = vector.broadcast %cst_13 : f32 to vector<8x128xf32>
    %23 = arith.subf %14, %22 : vector<8x128xf32>
    %24 = arith.negf %23 : vector<8x128xf32>
    %25 = math.exp %24 : vector<8x128xf32>
    %cst_14 = arith.constant 1.000000e+00 : f32
    %26 = vector.broadcast %cst_14 : f32 to vector<8x128xf32>
    %27 = arith.addf %26, %25 : vector<8x128xf32>
    %28 = arith.divf %26, %27 : vector<8x128xf32>
    %c0_15 = arith.constant 0 : index
    %c0_16 = arith.constant 0 : index
    %29 = vector.load %arg10[%c0_15, %c0_16] : memref<8x128xf32, #tpu.memory_space<vmem>>, vector<8x128xf32>
    %30 = arith.mulf %21, %29 : vector<8x128xf32>
    %cst_17 = arith.constant 1.000000e+00 : f32
    %31 = vector.broadcast %cst_17 : f32 to vector<8x128xf32>
    %32 = arith.subf %31, %28 : vector<8x128xf32>
    %33 = arith.mulf %32, %16 : vector<8x128xf32>
    %34 = arith.addf %30, %33 : vector<8x128xf32>
    %c0_18 = arith.constant 0 : index
    %c0_19 = arith.constant 0 : index
    %35 = vector.load %arg10[%c0_18, %c0_19] : memref<8x128xf32, #tpu.memory_space<vmem>>, vector<8x128xf32>
    tpu.vector_store %arg10[%c0_18, %c0_19], %34 {strides = array<i32>} : memref<8x128xf32, #tpu.memory_space<vmem>>, vector<8x128xf32>,
    %c0_20 = arith.constant 0 : index
    %c0_21 = arith.constant 0 : index
    %36 = vector.load %arg9[%c0_20, %c0_21] : memref<8x128xf32, #tpu.memory_space<vmem>>, vector<8x128xf32>
    tpu.vector_store %arg9[%c0_20, %c0_21], %34 {strides = array<i32>} : memref<8x128xf32, #tpu.memory_space<vmem>>, vector<8x128xf32>,
    %c0_22 = arith.constant 0 : index
    %c0_23 = arith.constant 0 : index
    %c0_24 = arith.constant 0 : index
    %37 = vector.load %arg8[%c0_22, %c0_23, %c0_24] : memref<1x8x128xf32, #tpu.memory_space<vmem>>, vector<1x8x128xf32>
    %38 = vector.shape_cast %37 : vector<1x8x128xf32> to vector<8x128xf32>
    %39 = vector.shape_cast %34 : vector<8x128xf32> to vector<1x8x128xf32>
    tpu.vector_store %arg8[%c0_22, %c0_23, %c0_24], %39 {strides = array<i32>} : memref<1x8x128xf32, #tpu.memory_space<vmem>>, vector<1x8x128xf32>,
    return
  }
  func.func @transform_0(%arg0: i32, %arg1: i32) -> (i32, i32, i32) {
    %c0_i32 = arith.constant 0 : i32
    %c0_i32_0 = arith.constant 0 : i32
    return %arg1, %arg0, %c0_i32 : i32, i32, i32
  }
  func.func @transform_1(%arg0: i32, %arg1: i32) -> (i32, i32) {
    %c0_i32 = arith.constant 0 : i32
    %c0_i32_0 = arith.constant 0 : i32
    return %arg0, %c0_i32 : i32, i32
  }
  func.func @transform_2(%arg0: i32, %arg1: i32) -> (i32, i32) {
    %c0_i32 = arith.constant 0 : i32
    %c0_i32_0 = arith.constant 0 : i32
    return %arg0, %c0_i32 : i32, i32
  }
  func.func @transform_3(%arg0: i32, %arg1: i32) -> (i32, i32) {
    %c0_i32 = arith.constant 0 : i32
    %c0_i32_0 = arith.constant 0 : i32
    %c0_i32_1 = arith.constant 0 : i32
    return %c0_i32, %c0_i32_0 : i32, i32
  }
  func.func @transform_4(%arg0: i32, %arg1: i32) -> (i32, i32) {
    %c0_i32 = arith.constant 0 : i32
    %c0_i32_0 = arith.constant 0 : i32
    %c0_i32_1 = arith.constant 0 : i32
    return %c0_i32, %c0_i32_0 : i32, i32
  }
  func.func @transform_5(%arg0: i32, %arg1: i32) -> (i32, i32) {
    %c0_i32 = arith.constant 0 : i32
    %c0_i32_0 = arith.constant 0 : i32
    %c0_i32_1 = arith.constant 0 : i32
    return %c0_i32, %c0_i32_0 : i32, i32
  }
  func.func @transform_6(%arg0: i32, %arg1: i32) -> (i32, i32, i32) {
    %c0_i32 = arith.constant 0 : i32
    %c0_i32_0 = arith.constant 0 : i32
    return %arg1, %arg0, %c0_i32 : i32, i32, i32
  }
}

</mosaic_0001>

<bundles_post_ra>
// kernel: tpu_custom_call.1
= control target key start
LH: loop header
LB: loop body
LE: loop exit
PB: predicated region body
PF: predicated region fallthrough
CT: control target
= control target key end

     0   :  { %11 = vsyncpa [#allocation5], 0  ;;  %s715_s0 = inlined_call_operand.hbm [shape: f32[1,8,128], index: 0, kind: input, shape index: {}]   ;;  %s716_s1 = inlined_call_operand.hbm [shape: f32[8,128], index: 1, kind: input, shape index: {}]   ;;  %s717_s2 = inlined_call_operand.hbm [shape: f32[8,128], index: 2, kind: input, shape index: {}]   ;;  %s718_s3 = inlined_call_operand.hbm [shape: f32[128,256], index: 3, kind: input, shape index: {}]   ;;  %s719_s4 = inlined_call_operand.hbm [shape: f32[128,256], index: 4, kind: input, shape index: {}]   ;;  %s720_s5 = inlined_call_operand.vmem [shape: f32[1,256], index: 5, kind: input, shape index: {}]   ;;  %s721_s6 = inlined_call_operand.hbm [shape: f32[1,8,128], index: 6, kind: output, shape index: {}]  }
   0x1   :  { %12 = vsyncpa [#allocation8], 0 }
   0x2   :  { %13 = vsyncpa [#allocation11], 0 }
   0x3   :  { %14 = vsyncpa [#allocation6], 0  ;;  %s583_s21 = smov [#allocation7]   ;;  %s584_s23 = smov [#allocation10]  }
   0x4   :  { %s31_s22 = sshll.u32 %s583_s21, 4  ;;  %s50_s24 = sshll.u32 %s584_s23, 4  ;;  %s32_s22 = int_to_ptr.vmem [resolvable:$true] %s31_s22  ;;  %s627_s24 = int_to_ptr.vmem [resolvable:$true] %s50_s24 }
   0x5   :  { %s443_s27 = scalar_lea.hbm %s716_s1, 128 }
   0x6   :  { %p444_p0 = scmp.ne.s32.totalorder %s716_s1, %s443_s27  ;;  %p447_p1 = scmp.lt.u32.totalorder %s443_s27, %s716_s1 }
   0x8   :  { %p449_p2 = pnand %p447_p1, %p444_p0 }
   0xa   :  { %452 = shalt.err (!%p449_p2)
}
   0xb   :  { %s453_s8 = scalar_lea.vmem %s32_s22, 128  ;;  %p458_p4 = scmp.lt.s32.totalorder %s32_s22, %s32_s22 }
   0xc   :  { %p454_p3 = scmp.ne.s32.totalorder %s32_s22, %s453_s8  ;;  %p459_p5 = scmp.lt.s32.totalorder %s453_s8, %s453_s8 }
   0xe   :  { %p460_p6 = por %p459_p5, %p458_p4 }
  0x10   :  { %p461_p7 = pnand %p460_p6, %p454_p3 }
  0x12   :  { %464 = shalt.err (!%p461_p7)
}
  0x13   :  { %34 = dma.hbm_to_vmem [thread:$0]  %s716_s1, 128, %s32_s22, [#allocation8]  }
  0x14   :  { %s465_s13 = scalar_lea.hbm %s718_s3, 4096 }
  0x15   :  { %p466_p8 = scmp.ne.s32.totalorder %s718_s3, %s465_s13  ;;  %p469_p9 = scmp.lt.u32.totalorder %s465_s13, %s718_s3 }
  0x17   :  { %p471_p10 = pnand %p469_p9, %p466_p8 }
  0x19   :  { %474 = shalt.err (!%p471_p10)
}
  0x1a   :  { %s475_s18 = scalar_lea.vmem %s627_s24, 4096  ;;  %p480_p12 = scmp.lt.s32.totalorder %s627_s24, %s627_s24 }
  0x1b   :  { %p476_p11 = scmp.ne.s32.totalorder %s627_s24, %s475_s18  ;;  %p481_p13 = scmp.lt.s32.totalorder %s475_s18, %s475_s18 }
  0x1d   :  { %p482_p0 = por %p481_p13, %p480_p12 }
  0x1f   :  { %p483_p1 = pnand %p482_p0, %p476_p11 }
  0x21   :  { %486 = shalt.err (!%p483_p1)
}
  0x22   :  { %s585_s1 = smov 256   ;;  %s586_s19 = smov 16  }
  0x23   :  { %56 = dma.hbm_to_vmem [thread:$0]  %s718_s3, 4096, %s627_s24, [#allocation11], %s585_s1, %s585_s1, %s586_s19  }
  0x24   :  { %s587_s22 = smov [#allocation4]   ;;  %s588_s25 = smov [#allocation9]  }
  0x25   :  { %s21_s23 = sshll.u32 %s587_s22, 4  ;;  %s41_s26 = sshll.u32 %s588_s25, 4  ;;  %s22_s23 = int_to_ptr.vmem [resolvable:$true] %s21_s23  ;;  %s42_s26 = int_to_ptr.vmem [resolvable:$true] %s41_s26 }
  0x26   :  { %s487_s29 = scalar_lea.hbm %s715_s0, 128 }
  0x27   :  { %p488_p2 = scmp.ne.s32.totalorder %s715_s0, %s487_s29  ;;  %p491_p3 = scmp.lt.u32.totalorder %s487_s29, %s715_s0 }
  0x29   :  { %p493_p4 = pnand %p491_p3, %p488_p2 }
  0x2b   :  { %496 = shalt.err (!%p493_p4)
}
  0x2c   :  { %s497_s3 = scalar_lea.vmem %s22_s23, 128  ;;  %p502_p6 = scmp.lt.s32.totalorder %s22_s23, %s22_s23 }
  0x2d   :  { %p498_p5 = scmp.ne.s32.totalorder %s22_s23, %s497_s3  ;;  %p503_p7 = scmp.lt.s32.totalorder %s497_s3, %s497_s3 }
  0x2f   :  { %p504_p8 = por %p503_p7, %p502_p6 }
  0x31   :  { %p505_p9 = pnand %p504_p8, %p498_p5 }
  0x33   :  { %508 = shalt.err (!%p505_p9)
}
  0x34   :  { %24 = dma.hbm_to_vmem [thread:$0]  %s715_s0, 128, %s22_s23, [#allocation5]  }
  0x35   :  { %s509_s13 = scalar_lea.hbm %s717_s2, 128 }
  0x36   :  { %p510_p10 = scmp.ne.s32.totalorder %s717_s2, %s509_s13  ;;  %p513_p11 = scmp.lt.u32.totalorder %s509_s13, %s717_s2 }
  0x38   :  { %p515_p12 = pnand %p513_p11, %p510_p10 }
  0x3a   :  { %518 = shalt.err (!%p515_p12)
}
  0x3b   :  { %s519_s18 = scalar_lea.vmem %s42_s26, 128  ;;  %p524_p0 = scmp.lt.s32.totalorder %s42_s26, %s42_s26 }
  0x3c   :  { %p520_p13 = scmp.ne.s32.totalorder %s42_s26, %s519_s18  ;;  %p525_p1 = scmp.lt.s32.totalorder %s519_s18, %s519_s18 }
  0x3e   :  { %p526_p2 = por %p525_p1, %p524_p0 }
  0x40   :  { %p527_p3 = pnand %p526_p2, %p520_p13 }
  0x42   :  { %530 = shalt.err (!%p527_p3)
}
  0x43   :  { %44 = dma.hbm_to_vmem [thread:$0]  %s717_s2, 128, %s42_s26, [#allocation8]  }
  0x44   :  { %s589_s21 = smov [#allocation12]   ;;  %s531_s27 = scalar_lea.hbm %s719_s4, 4096 }
  0x45   :  { %s62_s22 = sshll.u32 %s589_s21, 4  ;;  %p532_p4 = scmp.ne.s32.totalorder %s719_s4, %s531_s27  ;;  %s63_s22 = int_to_ptr.vmem [resolvable:$true] %s62_s22 }
  0x46   :  { %p535_p5 = scmp.lt.u32.totalorder %s531_s27, %s719_s4 }
  0x48   :  { %p537_p6 = pnand %p535_p5, %p532_p4 }
  0x4a   :  { %540 = shalt.err (!%p537_p6)
}
  0x4b   :  { %s541_s8 = scalar_lea.vmem %s63_s22, 4096  ;;  %p546_p8 = scmp.lt.s32.totalorder %s63_s22, %s63_s22 }
  0x4c   :  { %p542_p7 = scmp.ne.s32.totalorder %s63_s22, %s541_s8  ;;  %p547_p9 = scmp.lt.s32.totalorder %s541_s8, %s541_s8 }
  0x4e   :  { %p548_p10 = por %p547_p9, %p546_p8 }
  0x50   :  { %p549_p11 = pnand %p548_p10, %p542_p7 }
  0x52   :  { %552 = shalt.err (!%p549_p11)
}
  0x53   :  { %68 = dma.hbm_to_vmem [thread:$0]  %s719_s4, 4096, %s63_s22, [#allocation11], %s585_s1, %s585_s1, %s586_s19  }
  0x54   :  { %575 = dma.done.wait [#allocation5], 128  }
  0x55   :  { %576 = vsyncadd [#allocation5], 4294967168 }
  0x56   :  { %577 = dma.done.wait [#allocation8], 256  }
  0x57   :  { %578 = vsyncadd [#allocation8], 4294967040 }
  0x58   :  { %579 = dma.done.wait [#allocation11], 8192  }
  0x59   :  { %580 = vsyncadd [#allocation11], 4294959104  ;;  %v590_v0 = vmov 0.0   ;;  %v129_v1 = vld [vmem:[#allocation12 + $0x8] sm:$0xff]  ;;  %v131_v2 = vld [vmem:[#allocation12 + $0x18] sm:$0xff] }
  0x5a   :  { %224 = vmatprep.mubr.f32.mxu1 %v590_v0  ;;  %295 = vmatprep.mubr.f32.mxu0 %v590_v0  ;;  %v96_v3 = vld [vmem:[#allocation10 + $0x8] sm:$0xff]  ;;  %v358_v4 = vpack.c.bf16 %v131_v2, %v129_v1  ;;  %v98_v5 = vld [vmem:[#allocation10 + $0x18] sm:$0xff]  ;;  %v128_v6 = vld [vmem:[#allocation12] sm:$0xff] }
  0x5b   :  { %v130_v7 = vld [vmem:[#allocation12 + $0x10] sm:$0xff]  ;;  %v390_v8 = vpack.c.bf16 %v98_v5, %v96_v3  ;;  %v95_v10 = vld [vmem:[#allocation10] sm:$0xff]  ;;  %v133_v12 = vld [vmem:[#allocation12 + $0x28] sm:$0xff] }
  0x5c   :  { %v360_v9 = vpack.c.bf16 %v130_v7, %v128_v6  ;;  %v97_v11 = vld [vmem:[#allocation10 + $0x10] sm:$0xff]  ;;  %359 = vmatprep.subr.bf16.mxu1 %v358_v4  ;;  %v135_v14 = vld [vmem:[#allocation12 + $0x38] sm:$0xff]  ;;  %v100_v15 = vld [vmem:[#allocation10 + $0x28] sm:$0xff] }
  0x5d   :  { %v392_v13 = vpack.c.bf16 %v97_v11, %v95_v10  ;;  %v102_v16 = vld [vmem:[#allocation10 + $0x38] sm:$0xff]  ;;  %391 = vmatprep.subr.bf16.mxu0 %v390_v8  ;;  %v362_v17 = vpack.c.bf16 %v135_v14, %v133_v12  ;;  %v132_v19 = vld [vmem:[#allocation12 + $0x20] sm:$0xff]  ;;  %v134_v20 = vld [vmem:[#allocation12 + $0x30] sm:$0xff] }
  0x5e   :  { %361 = vmatpush1.bf16.msra.mxu1 %v360_v9  ;;  %v394_v18 = vpack.c.bf16 %v102_v16, %v100_v15  ;;  %v99_v21 = vld [vmem:[#allocation10 + $0x20] sm:$0xff]  ;;  %v364_v22 = vpack.c.bf16 %v134_v20, %v132_v19  ;;  %v101_v23 = vld [vmem:[#allocation10 + $0x30] sm:$0xff]  ;;  %v137_v24 = vld [vmem:[#allocation12 + $0x48] sm:$0xff] }
  0x5f   :  { %393 = vmatpush1.bf16.msra.mxu0 %v392_v13  ;;  %v139_v25 = vld [vmem:[#allocation12 + $0x58] sm:$0xff]  ;;  %363 = vmatprep.subr.bf16.mxu1 %v362_v17  ;;  %v396_v26 = vpack.c.bf16 %v101_v23, %v99_v21  ;;  %v104_v28 = vld [vmem:[#allocation10 + $0x48] sm:$0xff]  ;;  %v136_v30 = vld [vmem:[#allocation12 + $0x40] sm:$0xff] }
  0x60   :  { %395 = vmatprep.subr.bf16.mxu0 %v394_v18  ;;  %v366_v27 = vpack.c.bf16 %v139_v25, %v137_v24  ;;  %v106_v29 = vld [vmem:[#allocation10 + $0x58] sm:$0xff]  ;;  %v138_v32 = vld [vmem:[#allocation12 + $0x50] sm:$0xff]  ;;  %v103_v33 = vld [vmem:[#allocation10 + $0x40] sm:$0xff] }
  0x61   :  { %v398_v31 = vpack.c.bf16 %v106_v29, %v104_v28  ;;  %v105_v34 = vld [vmem:[#allocation10 + $0x50] sm:$0xff]  ;;  %v368_v35 = vpack.c.bf16 %v138_v32, %v136_v30  ;;  %v141_v36 = vld [vmem:[#allocation12 + $0x68] sm:$0xff]  ;;  %v143_v37 = vld [vmem:[#allocation12 + $0x78] sm:$0xff] }
  0x62   :  { %365 = vmatpush1.bf16.msra.mxu1 %v364_v22  ;;  %v108_v38 = vld [vmem:[#allocation10 + $0x68] sm:$0xff]  ;;  %v400_v39 = vpack.c.bf16 %v105_v34, %v103_v33  ;;  %v370_v40 = vpack.c.bf16 %v143_v37, %v141_v36  ;;  %v110_v41 = vld [vmem:[#allocation10 + $0x78] sm:$0xff]  ;;  %v140_v42 = vld [vmem:[#allocation12 + $0x60] sm:$0xff] }
  0x63   :  { %397 = vmatpush1.bf16.msra.mxu0 %v396_v26  ;;  %367 = vmatprep.subr.bf16.mxu1 %v366_v27  ;;  %v142_v43 = vld [vmem:[#allocation12 + $0x70] sm:$0xff]  ;;  %v402_v44 = vpack.c.bf16 %v110_v41, %v108_v38  ;;  %v107_v45 = vld [vmem:[#allocation10 + $0x60] sm:$0xff]  ;;  %v145_v47 = vld [vmem:[#allocation12 + $0x88] sm:$0xff] }
  0x64   :  { %399 = vmatprep.subr.bf16.mxu0 %v398_v31  ;;  %v109_v46 = vld [vmem:[#allocation10 + $0x70] sm:$0xff]  ;;  %v147_v48 = vld [vmem:[#allocation12 + $0x98] sm:$0xff]  ;;  %v112_v49 = vld [vmem:[#allocation10 + $0x88] sm:$0xff]  ;;  %v372_v51 = vpack.c.bf16 %v142_v43, %v140_v42 }
  0x65   :  { %v114_v50 = vld [vmem:[#allocation10 + $0x98] sm:$0xff]  ;;  %v404_v52 = vpack.c.bf16 %v109_v46, %v107_v45  ;;  %v374_v53 = vpack.c.bf16 %v147_v48, %v145_v47  ;;  %v144_v54 = vld [vmem:[#allocation12 + $0x80] sm:$0xff]  ;;  %v146_v55 = vld [vmem:[#allocation12 + $0x90] sm:$0xff] }
  0x66   :  { %369 = vmatpush1.bf16.msra.mxu1 %v368_v35  ;;  %v111_v56 = vld [vmem:[#allocation10 + $0x80] sm:$0xff]  ;;  %v406_v57 = vpack.c.bf16 %v114_v50, %v112_v49  ;;  %v113_v58 = vld [vmem:[#allocation10 + $0x90] sm:$0xff]  ;;  %v149_v59 = vld [vmem:[#allocation12 + $0xa8] sm:$0xff]  ;;  %v376_v63 = vpack.c.bf16 %v146_v55, %v144_v54  ;;  %v304_v35 = vlaneseq }
  0x67   :  { %401 = vmatpush1.bf16.msra.mxu0 %v400_v39  ;;  %371 = vmatprep.subr.bf16.mxu1 %v370_v40  ;;  %v151_v60 = vld [vmem:[#allocation12 + $0xb8] sm:$0xff]  ;;  %v116_v61 = vld [vmem:[#allocation10 + $0xa8] sm:$0xff]  ;;  %v408_v0 = vpack.c.bf16 %v113_v58, %v111_v56  ;;  %v148_v2 = vld [vmem:[#allocation12 + $0xa0] sm:$0xff] }
  0x68   :  { %403 = vmatprep.subr.bf16.mxu0 %v402_v44  ;;  %v118_v62 = vld [vmem:[#allocation10 + $0xb8] sm:$0xff]  ;;  %v378_v1 = vpack.c.bf16 %v151_v60, %v149_v59  ;;  %v150_v3 = vld [vmem:[#allocation12 + $0xb0] sm:$0xff]  ;;  %v115_v4 = vld [vmem:[#allocation10 + $0xa0] sm:$0xff]  ;;  %v305_v36 = vshrl.u32 %v304_v35, 7 }
  0x69   :  { %v410_v5 = vpack.c.bf16 %v118_v62, %v116_v61  ;;  %v117_v6 = vld [vmem:[#allocation10 + $0xb0] sm:$0xff]  ;;  %v153_v7 = vld [vmem:[#allocation12 + $0xc8] sm:$0xff]  ;;  %v155_v8 = vld [vmem:[#allocation12 + $0xd8] sm:$0xff]  ;;  %v380_v11 = vpack.c.bf16 %v150_v3, %v148_v2 }
  0x6a   :  { %373 = vmatpush1.bf16.msra.mxu1 %v372_v51  ;;  %v120_v9 = vld [vmem:[#allocation10 + $0xc8] sm:$0xff]  ;;  %v122_v10 = vld [vmem:[#allocation10 + $0xd8] sm:$0xff]  ;;  %v412_v12 = vpack.c.bf16 %v117_v6, %v115_v4  ;;  %v382_v13 = vpack.c.bf16 %v155_v8, %v153_v7  ;;  %v152_v14 = vld [vmem:[#allocation12 + $0xc0] sm:$0xff]  ;;  %v306_v37 = vsub.s32 0, %v305_v36  ;;  %v310_v50 = vsub.s32 1, %v305_v36 }
  0x6b   :  { %405 = vmatpush1.bf16.msra.mxu0 %v404_v52  ;;  %375 = vmatprep.subr.bf16.mxu1 %v374_v53  ;;  %v154_v15 = vld [vmem:[#allocation12 + $0xd0] sm:$0xff]  ;;  %v119_v16 = vld [vmem:[#allocation10 + $0xc0] sm:$0xff]  ;;  %v414_v17 = vpack.c.bf16 %v122_v10, %v120_v9  ;;  %v157_v19 = vld [vmem:[#allocation12 + $0xe8] sm:$0xff] }
  0x6c   :  { %407 = vmatprep.subr.bf16.mxu0 %v406_v57  ;;  %v121_v18 = vld [vmem:[#allocation10 + $0xd0] sm:$0xff]  ;;  %v159_v20 = vld [vmem:[#allocation12 + $0xf8] sm:$0xff]  ;;  %v124_v21 = vld [vmem:[#allocation10 + $0xe8] sm:$0xff]  ;;  %v384_v23 = vpack.c.bf16 %v154_v15, %v152_v14 }
  0x6d   :  { %v126_v22 = vld [vmem:[#allocation10 + $0xf8] sm:$0xff]  ;;  %v416_v24 = vpack.c.bf16 %v121_v18, %v119_v16  ;;  %v386_v25 = vpack.c.bf16 %v159_v20, %v157_v19  ;;  %v156_v26 = vld [vmem:[#allocation12 + $0xe0] sm:$0xff]  ;;  %v158_v27 = vld [vmem:[#allocation12 + $0xf0] sm:$0xff] }
  0x6e   :  { %377 = vmatpush1.bf16.msra.mxu1 %v376_v63  ;;  %v418_v28 = vpack.c.bf16 %v126_v22, %v124_v21  ;;  %v123_v29 = vld [vmem:[#allocation10 + $0xe0] sm:$0xff]  ;;  %v125_v30 = vld [vmem:[#allocation10 + $0xf0] sm:$0xff]  ;;  %v388_v31 = vpack.c.bf16 %v158_v27, %v156_v26  ;;  %v94_v34 = vld [vmem:[#allocation4] sm:$0xff] }
  0x6f   :  { %409 = vmatpush1.bf16.msra.mxu0 %v408_v0  ;;  %379 = vmatprep.subr.bf16.mxu1 %v378_v1  ;;  %v420_v32 = vpack.c.bf16 %v125_v30, %v123_v29  ;;  %v90_v33 = vld [vmem:[#allocation7] sm:$0xff]  ;;  %v302_v38 = vld [vmem:[%s720_s5] sm:$0x3]  ;;  %v92_v59 = vld [vmem:[#allocation9] sm:$0xff]  ;;  %s591_s5 = smov [#allocation13]  }
  0x70   :  { %411 = vmatprep.subr.bf16.mxu0 %v410_v5  ;;  %v307_v40 = vrot.slane %v302_v38, %v306_v37  ;;  %v311_v51 = vrot.slane %v302_v38, %v310_v50  ;;  %s344_s19 = sshll.u32 %s591_s5, 4  ;;  %s345_s19 = int_to_ptr.vmem [resolvable:$true] %s344_s19 }
  0x71   :  { %s553_s9 = scalar_lea.vmem %s345_s19, 128  ;;  %p558_p13 = scmp.lt.s32.totalorder %s345_s19, %s345_s19 }
  0x72   :  { %381 = vmatpush1.bf16.msra.mxu1 %v380_v11  ;;  %p554_p12 = scmp.ne.s32.totalorder %s345_s19, %s553_s9  ;;  %p559_p0 = scmp.lt.s32.totalorder %s553_s9, %s553_s9 }
  0x73   :  { %413 = vmatpush1.bf16.msra.mxu0 %v412_v12  ;;  %383 = vmatprep.subr.bf16.mxu1 %v382_v13 }
  0x74   :  { %415 = vmatprep.subr.bf16.mxu0 %v414_v17  ;;  %p560_p1 = por %p559_p0, %p558_p13 }
  0x76   :  { %385 = vmatpush1.bf16.msra.mxu1 %v384_v23  ;;  %p561_p2 = pnand %p560_p1, %p554_p12 }
  0x77   :  { %417 = vmatpush1.bf16.msra.mxu0 %v416_v24  ;;  %387 = vmatprep.subr.bf16.mxu1 %v386_v25 }
  0x78   :  { %419 = vmatprep.subr.bf16.mxu0 %v418_v28 }
  0x7a   :  { %389 = vmatpush1.bf16.msra.mxu1 %v388_v31 }
  0x7b   :  { %421 = vmatpush1.bf16.msra.mxu0 %v420_v32 }
  0x7d   :  { %225 = vmatmul.mubr.f32.vlgmr.msra.gmra.mrb[0].mxu1 %v90_v33 }
  0x7e   :  { %296 = vmatmul.mubr.f32.vlgmr.msra.gmra.mrb[0].mxu0 %v94_v34 }
 0x150   :  { %v226_v39 = vpop.f32.mrb[0].mxu1 }
 0x151   :  { %v297_v41 = vpop.f32.mrb[0].mxu0  ;;  %v228_v42 = vpop.f32.mrb[1].mxu1 }
 0x152   :  { %v298_v43 = vadd.f32 %v297_v41, %v226_v39  ;;  %v299_v44 = vpop.f32.mrb[1].mxu0 }
 0x153   :  { %v300_v45 = vadd.f32 %v299_v44, %v228_v42 }
 0x154   :  { %v314_v46 = vadd.f32 %v307_v40, %v298_v43 }
 0x155   :  { %v315_v56 = vadd.f32 %v311_v51, %v300_v45 }
 0x156   :  { %v355_v47 = vmul.f32 -1.442695, %v314_v46  ;;  %v356_v48 = vadd.f32 -1.0, %v314_v46 }
 0x158   :  { %433 = vpow2.f32 %v355_v47  ;;  %v357_v49 = vmul.f32 -1.442695, %v356_v48 }
 0x15a   :  { %435 = vpow2.f32 %v357_v49 }
 0x162   :  { %v434_v52 = vpop.eup %433 }
 0x163   :  { %v320_v53 = vadd.f32 1.0, %v434_v52 }
 0x164   :  { %v436_v54 = vpop.eup %435 }
 0x165   :  { %v327_v55 = vadd.f32 1.0, %v436_v54  ;;  %437 = vrcp.f32 %v320_v53 }
 0x167   :  { %439 = vrcp.f32 %v327_v55 }
 0x168   :  { %441 = vtanh.f32 %v315_v56 }
 0x16f   :  { %v438_v57 = vpop.eup %437 }
 0x170   :  { %v331_v62 = vmul.f32 %v438_v57, %v92_v59 }
 0x171   :  { %v440_v58 = vpop.eup %439 }
 0x172   :  { %v332_v60 = vsub.f32 1.0, %v440_v58  ;;  %v442_v61 = vpop.eup %441 }
 0x174   :  { %v333_v63 = vmul.f32 %v442_v61, %v332_v60 }
 0x176   :  { %v334_v0 = vadd.f32 %v333_v63, %v331_v62 }
 0x178   :  { %337 = vst [vmem:[#allocation13] sm:$0xff] %v334_v0 }
 0x179   :  { %564 = shalt.err (!%p561_p2)
}
 0x17a   :  { %s565_s10 = scalar_lea.hbm %s721_s6, 128 }
 0x17b   :  { %p566_p3 = scmp.ne.s32.totalorder %s721_s6, %s565_s10  ;;  %p569_p4 = scmp.lt.u32.totalorder %s565_s10, %s721_s6 }
 0x17d   :  { %p571_p5 = pnand %p569_p4, %p566_p3 }
 0x17f   :  { %574 = shalt.err (!%p571_p5)
}
 0x180   :  { %347 = dma.vmem_to_hbm [thread:$0]  %s345_s19, 128, %s721_s6, [#allocation6]  }
 0x181   :  { %581 = dma.done.wait [#allocation6], 128  }
 0x182   :  { %582 = vsyncadd [#allocation6], 4294967168 }
 0x183   :  { %351 = vsyncpa [#allocation5], 1 }
 0x184   :  { %352 = vsyncpa [#allocation8], 1 }
 0x185   :  { %353 = vsyncpa [#allocation11], 1 }
 0x186   :  { %354 = vsyncpa [#allocation6], 1 }

</bundles_post_ra>
